<compile_context>
chip_gen: v7x
topology: tpu7x:2x2x1
jax: 0.10.0
libtpu: 0.0.40
codegen_flags: <defaults>
</compile_context>

<pallas_src>
import jax
import jax.numpy as jnp
import numpy as np
from jax.experimental import pallas as pl
from jax.experimental.pallas import tpu as pltpu


# ----------------------------------------------------------------------------
# Kernel 1: fused, fully-parallel precompute over L tiles (flat (TL*B, H) rows)
#   A   = h_re @ W1a                      -> (L*B, H)   (query-side projection)
#   Bm  = h_re @ W1b                      -> (L*B, H)   (key-side projection)
#   Gp  = max over tile of tanh(h_share@Wra + h_re@Wrb + br)  -> (L/TL, B, H)
# One wide MXU pass h_re @ [W1a | W1b | Wrb] replaces three narrow ones.
# ----------------------------------------------------------------------------
def precompute_kernel(hs_ref, hr_ref, wra_ref, wcat_ref, br_ref,
                      a_ref, bm_ref, gp_ref):
    TLB, H = hr_ref.shape
    B = gp_ref.shape[1]
    TL = TLB // B

    proj = jnp.dot(hr_ref[...], wcat_ref[...],
                   preferred_element_type=jnp.float32)            # (TL*B, 3H)
    a_ref[...] = proj[:, :H].astype(a_ref.dtype)
    bm_ref[...] = proj[:, H:2 * H].astype(bm_ref.dtype)

    gt = jnp.tanh(jnp.dot(hs_ref[...], wra_ref[...],
                          preferred_element_type=jnp.float32)
                  + proj[:, 2 * H:] + br_ref[...])                # (TL*B, H)
    # per-tile running max over the TL sequence positions (per batch element)
    gp_ref[...] = jnp.max(gt.reshape(TL, B, H), axis=0)[None, :, :]


# ----------------------------------------------------------------------------
# Kernel 2: pairwise relation scores for an (i-tile, j-tile) block.
#   out[i, j, b*R + r] = sigmoid( ELU(LN(A[i,b] + Bm[j,b] + C[b])) @ W2 + b2 )[r]
#                        * mask[i,b] * mask[j,b]
# Loops over the TI query rows; per-iteration temporaries are (TJ*B, H)-sized.
# ----------------------------------------------------------------------------
def re_kernel(a_ref, bm_ref, c_ref, mi_ref, mj_ref,
              gamma_ref, beta_ref, w2_ref, b2_ref, out_ref):
    TI, B, H = a_ref.shape
    TJ = bm_ref.shape[0]
    R = w2_ref.shape[1]

    bm = bm_ref[...]                 # (TJ, B, H), kept in VMEM across the i loop
    c = c_ref[...]                   # (B, H)  f32
    gamma = gamma_ref[...]           # (1, H)
    beta = beta_ref[...]             # (1, H)
    w2 = w2_ref[...]                 # (H, R)  f32
    b2 = b2_ref[...]                 # (1, R)
    mj = mj_ref[...]                 # (TJ, B, 1)

    def body(ii, carry):
        bias = a_ref[ii].astype(jnp.float32) + c                  # (B, H)
        # implicit broadcast over the leading (TJ) axis -> one (TJ,B,H) temp
        pre = (bm + bias[None, :, :]).reshape(TJ * B, H).astype(jnp.float32)

        # LayerNorm over H (eps=1e-5, biased var, f32), then ELU (dropout=id).
        mu = jnp.mean(pre, axis=-1, keepdims=True)
        xc = pre - mu
        var = jnp.mean(xc * xc, axis=-1, keepdims=True)
        xn = xc * jax.lax.rsqrt(var + 1e-5) * gamma + beta
        h = jnp.where(xn > 0, xn, jnp.expm1(jnp.minimum(xn, 0.0)))

        logits = jnp.dot(h, w2, preferred_element_type=jnp.float32) + b2
        prob = jax.nn.sigmoid(logits).reshape(TJ, B, R)
        m = mj * mi_ref[ii][None, :, :]                           # (TJ, B, 1)
        # fold (b, r) into lanes -> dense (TJ, B*R) store into the output slab
        out_ref[ii] = (prob * m).reshape(TJ, B * R).astype(out_ref.dtype)
        return carry

    jax.lax.fori_loop(0, TI, body, 0)


# ----------------------------------------------------------------------------
# Wrapper
# ----------------------------------------------------------------------------
def _pick_tile(n, requested, ok=None):
    """Largest divisor of n that is <= requested and satisfies `ok`; else n
    (the full extent is always a legal block)."""
    if ok is None:
        ok = lambda t: True
    t = max(1, min(int(requested), n))
    while t >= 1:
        if n % t == 0 and ok(t):
            return t
        t -= 1
    return n


def re_unit_forward(h_re, h_share, mask, params, *,
                    tile_l=64, tile_i=64, tile_j=32,
                    compute_dtype=jnp.float32, out_dtype=jnp.float32,
                    vmem_limit_bytes=48 * 1024 * 1024):
    """ReUnit forward.  compute_dtype=bf16 uses bf16 MXU operands / A,Bm storage
    (recommended on v6e/v7x); LN stats, HxR projection and sigmoid stay f32.

    Per-generation tuning: keep vmem_limit_bytes <= ~48 MiB on v7x (64 MiB/TC);
    raise toward ~96-112 MiB and grow tile_i / tile_l on v5e/v6e (128 MiB)."""
    L, B, H = h_re.shape
    R = params["W2"].shape[1]
    f32 = jnp.float32
    cdt = compute_dtype

    # Tile constraints (so every BlockSpec dim is either a multiple of 8/128 or
    # equals the full array dim).  TI is unconstrained (3rd-from-last dims only).
    TL = _pick_tile(L, tile_l, lambda t: (t * B) % 8 == 0 or t == L)
    TI = _pick_tile(L, tile_i)
    TJ = _pick_tile(L, tile_j, lambda t: t % 8 == 0 or t == L)

    # Flatten to (L*B, H) in the wrapper (free, contiguous) -> reshape-free kernel 1.
    hr_flat = h_re.astype(cdt).reshape(L * B, H)
    hs_flat = h_share.astype(cdt).reshape(L * B, H)
    wra = params["Wra"].astype(cdt)
    wcat = jnp.concatenate([params["W1a"], params["W1b"], params["Wrb"]],
                           axis=1).astype(cdt)                    # (H, 3H)
    br = params["br"].astype(f32)

    n_tiles = L // TL

    # ---- Kernel 1: fused loop-invariant projections + per-tile tanh-max ------
    a_flat, bm_flat, gpart = pl.pallas_call(
        precompute_kernel,
        out_shape=(
            jax.ShapeDtypeStruct((L * B, H), cdt),        # A  = h_re @ W1a
            jax.ShapeDtypeStruct((L * B, H), cdt),        # Bm = h_re @ W1b
            jax.ShapeDtypeStruct((n_tiles, B, H), f32),   # per-tile max partials
        ),
        grid=(n_tiles,),
        in_specs=[
            pl.BlockSpec((TL * B, H), lambda t: (t, 0)),  # h_share (flat rows)
            pl.BlockSpec((TL * B, H), lambda t: (t, 0)),  # h_re    (flat rows)
            pl.BlockSpec((H, H), lambda t: (0, 0)),       # Wra
            pl.BlockSpec((H, 3 * H), lambda t: (0, 0)),   # [W1a | W1b | Wrb]
            pl.BlockSpec((1, H), lambda t: (0, 0)),       # br
        ],
        out_specs=(
            pl.BlockSpec((TL * B, H), lambda t: (t, 0)),
            pl.BlockSpec((TL * B, H), lambda t: (t, 0)),
            pl.BlockSpec((1, B, H), lambda t: (t, 0, 0)),
        ),
        compiler_params=pltpu.CompilerParams(
            dimension_semantics=("parallel",),            # no cross-step state
            vmem_limit_bytes=vmem_limit_bytes),
    )(hs_flat, hr_flat, wra, wcat, br)

    # Tiny XLA epilogue: global max over tiles, then C = g @ W1c + b1  -> (B, H)
    g = jnp.max(gpart, axis=0)
    c_bias = (g @ params["W1c"].astype(f32) + params["b1"].astype(f32)).astype(f32)

    a3 = a_flat.reshape(L, B, H)          # free, contiguous reshapes
    bm3 = bm_flat.reshape(L, B, H)
    mask3 = mask.astype(f32).reshape(L, B, 1)

    # ---- Kernel 2: pairwise relation scores -----------------------------------
    out_flat = pl.pallas_call(
        re_kernel,
        out_shape=jax.ShapeDtypeStruct((L, L, B * R), out_dtype),
        grid=(L // TI, L // TJ),          # j innermost -> A[i] stays resident
        in_specs=[
            pl.BlockSpec((TI, B, H), lambda i, j: (i, 0, 0)),   # A[i-tile]
            pl.BlockSpec((TJ, B, H), lambda i, j: (j, 0, 0)),   # Bm[j-tile]
            pl.BlockSpec((B, H), lambda i, j: (0, 0)),          # C
            pl.BlockSpec((TI, B, 1), lambda i, j: (i, 0, 0)),   # mask[i-tile]
            pl.BlockSpec((TJ, B, 1), lambda i, j: (j, 0, 0)),   # mask[j-tile]
            pl.BlockSpec((1, H), lambda i, j: (0, 0)),          # LN gamma
            pl.BlockSpec((1, H), lambda i, j: (0, 0)),          # LN beta
            pl.BlockSpec((H, R), lambda i, j: (0, 0)),          # W2
            pl.BlockSpec((1, R), lambda i, j: (0, 0)),          # b2
        ],
        out_specs=pl.BlockSpec((TI, TJ, B * R), lambda i, j: (i, j, 0)),
        compiler_params=pltpu.CompilerParams(
            dimension_semantics=("parallel", "parallel"),
            vmem_limit_bytes=vmem_limit_bytes),
    )(a3, bm3, c_bias, mask3, mask3,
      params["gamma"].astype(f32), params["beta"].astype(f32),
      params["W2"].astype(f32), params["b2"].astype(f32))

    return out_flat.reshape(L, L, B, R)                  # free (contiguous) reshape


# ----------------------------------------------------------------------------
# Pure-JAX reference (mirrors the torch forward, dropout = identity)
# ----------------------------------------------------------------------------
def re_unit_reference(h_re, h_share, mask, p):
    L, B, H = h_re.shape
    Wr = jnp.concatenate([p["Wra"], p["Wrb"]], axis=0)            # (2H, H)
    hg = jnp.tanh(jnp.concatenate([h_share, h_re], -1) @ Wr + p["br"])
    hg = jnp.max(hg, axis=0)                                      # (B, H)

    r1 = jnp.broadcast_to(h_re[:, None], (L, L, B, H))
    r2 = jnp.broadcast_to(h_re[None, :], (L, L, B, H))
    g4 = jnp.broadcast_to(hg[None, None], (L, L, B, H))
    W1 = jnp.concatenate([p["W1a"], p["W1b"], p["W1c"]], axis=0)  # (3H, H)
    x = jnp.concatenate([r1, r2, g4], -1)
    h = x @ W1 + p["b1"]
    mu = h.mean(-1, keepdims=True)
    var = ((h - mu) ** 2).mean(-1, keepdims=True)
    h = (h - mu) / jnp.sqrt(var + 1e-5) * p["gamma"][0] + p["beta"][0]
    h = jnp.where(h > 0, h, jnp.expm1(h))
    re = jax.nn.sigmoid(h @ p["W2"] + p["b2"][0])
    m = mask[:, None, :, None] * mask[None, :, :, None]
    return re * m


if __name__ == "__main__":
    # small shapes: seq L=16, batch B=2, hidden H=32, num_labels R=5
    L, B, H, R = 16, 2, 32, 5

    key = jax.random.PRNGKey(0)
    keys = jax.random.split(key, 10)

    h_re = jax.random.normal(keys[0], (L, B, H), jnp.float32)
    h_share = jax.random.normal(keys[1], (L, B, H), jnp.float32)
    lengths = jnp.array([11, 16])
    mask = (jnp.arange(L)[:, None] < lengths[None, :]).astype(jnp.float32)  # (L, B)

    s = 0.1
    params = {
        # r: Linear(2H -> H), weight split into (h_share, h_re) halves
        "Wra": s * jax.random.normal(keys[2], (H, H), jnp.float32),
        "Wrb": s * jax.random.normal(keys[3], (H, H), jnp.float32),
        "br":  s * jax.random.normal(keys[4], (1, H), jnp.float32),
        # hid2hid: Linear(3H -> H), split into (r1, r2, h_global) thirds
        "W1a": s * jax.random.normal(keys[5], (H, H), jnp.float32),
        "W1b": s * jax.random.normal(keys[6], (H, H), jnp.float32),
        "W1c": s * jax.random.normal(keys[7], (H, H), jnp.float32),
        "b1":  s * jax.random.normal(keys[8], (1, H), jnp.float32),
        # LayerNorm(H)
        "gamma": jnp.ones((1, H), jnp.float32),
        "beta":  jnp.zeros((1, H), jnp.float32),
        # hid2rel: Linear(H -> R)
        "W2":  s * jax.random.normal(keys[9], (H, R), jnp.float32),
        "b2":  jnp.zeros((1, R), jnp.float32),
    }

    ref = re_unit_reference(h_re, h_share, mask, params)

    # Small tiles so both grids have multiple steps (kernel-1: 4 steps; kernel-2: 2x2).
    out = re_unit_forward(h_re, h_share, mask, params,
                          tile_l=4, tile_i=8, tile_j=8)
    out = jax.block_until_ready(out)
    assert out.shape == (L, L, B, R), out.shape
    np.testing.assert_allclose(np.asarray(out), np.asarray(ref), atol=1e-3, rtol=1e-3)

    # bf16 MXU / A,Bm-storage fast path (v6e/v7x) -- looser tolerance.
    out_bf16 = re_unit_forward(h_re, h_share, mask, params,
                               tile_l=4, tile_i=8, tile_j=8,
                               compute_dtype=jnp.bfloat16)
    out_bf16 = jax.block_until_ready(out_bf16)
    np.testing.assert_allclose(np.asarray(out_bf16), np.asarray(ref),
                               atol=3e-2, rtol=3e-2)

    print("KERNEL_OK")
</pallas_src>

<mosaic_0001>
module attributes {stable_mosaic.version = 11 : i64} {
  func.func @precompute_kernel(%arg0: i32, %arg1: memref<8x32xf32, #tpu.memory_space<vmem>>, %arg2: memref<8x32xf32, #tpu.memory_space<vmem>>, %arg3: memref<32x32xf32, #tpu.memory_space<vmem>>, %arg4: memref<32x96xf32, #tpu.memory_space<vmem>>, %arg5: memref<1x32xf32, #tpu.memory_space<vmem>>, %arg6: memref<8x32xf32, #tpu.memory_space<vmem>>, %arg7: memref<8x32xf32, #tpu.memory_space<vmem>>, %arg8: memref<1x2x32xf32, #tpu.memory_space<vmem>>) attributes {dimension_semantics = [#tpu.dimension_semantics<parallel>], iteration_bounds = array<i64: 4>, scalar_prefetch = 0 : i64, scratch_operands = 0 : i64, tpu.core_type = #tpu.core_type<tc>, window_params = [{transform_indices = @transform_0, window_bounds = array<i64: 8, 32>}, {transform_indices = @transform_1, window_bounds = array<i64: 8, 32>}, {pipeline_mode = #tpu.pipeline_mode<synchronous>, transform_indices = @transform_2, window_bounds = array<i64: 32, 32>}, {pipeline_mode = #tpu.pipeline_mode<synchronous>, transform_indices = @transform_3, window_bounds = array<i64: 32, 96>}, {pipeline_mode = #tpu.pipeline_mode<synchronous>, transform_indices = @transform_4, window_bounds = array<i64: 1, 32>}, {transform_indices = @transform_5, window_bounds = array<i64: 8, 32>}, {transform_indices = @transform_6, window_bounds = array<i64: 8, 32>}, {transform_indices = @transform_7, window_bounds = array<i64: 1, 2, 32>}]} {
    %c0 = arith.constant 0 : index
    %c0_0 = arith.constant 0 : index
    %0 = vector.load %arg2[%c0, %c0_0] : memref<8x32xf32, #tpu.memory_space<vmem>>, vector<8x32xf32>
    %c0_1 = arith.constant 0 : index
    %c0_2 = arith.constant 0 : index
    %1 = vector.load %arg4[%c0_1, %c0_2] : memref<32x96xf32, #tpu.memory_space<vmem>>, vector<32x96xf32>
    %cst = arith.constant dense<0.000000e+00> : vector<8x96xf32>
    %2 = tpu.matmul %0, %1, %cst {dimension_numbers = #tpu.dot_dimension_numbers<[1], [0], [0], [1], [0, 0, 1, 1], [], []>} : vector<8x32xf32>, vector<32x96xf32>, vector<8x96xf32> -> vector<8x96xf32>
    %3 = vector.extract_strided_slice %2 {offsets = [0, 0], sizes = [8, 32], strides = [1, 1]} : vector<8x96xf32> to vector<8x32xf32>
    %c0_3 = arith.constant 0 : index
    %c0_4 = arith.constant 0 : index
    %4 = vector.load %arg6[%c0_3, %c0_4] : memref<8x32xf32, #tpu.memory_space<vmem>>, vector<8x32xf32>
    tpu.vector_store %arg6[%c0_3, %c0_4], %3 {strides = array<i32>} : memref<8x32xf32, #tpu.memory_space<vmem>>, vector<8x32xf32>,
    %5 = vector.extract_strided_slice %2 {offsets = [0, 32], sizes = [8, 32], strides = [1, 1]} : vector<8x96xf32> to vector<8x32xf32>
    %c0_5 = arith.constant 0 : index
    %c0_6 = arith.constant 0 : index
    %6 = vector.load %arg7[%c0_5, %c0_6] : memref<8x32xf32, #tpu.memory_space<vmem>>, vector<8x32xf32>
    tpu.vector_store %arg7[%c0_5, %c0_6], %5 {strides = array<i32>} : memref<8x32xf32, #tpu.memory_space<vmem>>, vector<8x32xf32>,
    %c0_7 = arith.constant 0 : index
    %c0_8 = arith.constant 0 : index
    %7 = vector.load %arg1[%c0_7, %c0_8] : memref<8x32xf32, #tpu.memory_space<vmem>>, vector<8x32xf32>
    %c0_9 = arith.constant 0 : index
    %c0_10 = arith.constant 0 : index
    %8 = vector.load %arg3[%c0_9, %c0_10] : memref<32x32xf32, #tpu.memory_space<vmem>>, vector<32x32xf32>
    %cst_11 = arith.constant dense<0.000000e+00> : vector<8x32xf32>
    %9 = tpu.matmul %7, %8, %cst_11 {dimension_numbers = #tpu.dot_dimension_numbers<[1], [0], [0], [1], [0, 0, 1, 1], [], []>} : vector<8x32xf32>, vector<32x32xf32>, vector<8x32xf32> -> vector<8x32xf32>
    %10 = vector.extract_strided_slice %2 {offsets = [0, 64], sizes = [8, 32], strides = [1, 1]} : vector<8x96xf32> to vector<8x32xf32>
    %11 = arith.addf %9, %10 : vector<8x32xf32>
    %c0_12 = arith.constant 0 : index
    %c0_13 = arith.constant 0 : index
    %12 = vector.load %arg5[%c0_12, %c0_13] : memref<1x32xf32, #tpu.memory_space<vmem>>, vector<1x32xf32>
    %13 = vector.broadcast %12 : vector<1x32xf32> to vector<8x32xf32>
    %14 = arith.addf %11, %13 : vector<8x32xf32>
    %15 = math.tanh %14 : vector<8x32xf32>
    %16 = vector.shape_cast %15 : vector<8x32xf32> to vector<4x2x32xf32>
    %cst_14 = arith.constant dense<0xFF800000> : vector<2x32xf32>
    %17 = vector.multi_reduction <maximumf>, %16, %cst_14 [0] : vector<4x2x32xf32> to vector<2x32xf32>
    %18 = vector.shape_cast %17 : vector<2x32xf32> to vector<1x2x32xf32>
    %c0_15 = arith.constant 0 : index
    %c0_16 = arith.constant 0 : index
    %c0_17 = arith.constant 0 : index
    %19 = vector.load %arg8[%c0_15, %c0_16, %c0_17] : memref<1x2x32xf32, #tpu.memory_space<vmem>>, vector<1x2x32xf32>
    tpu.vector_store %arg8[%c0_15, %c0_16, %c0_17], %18 {strides = array<i32>} : memref<1x2x32xf32, #tpu.memory_space<vmem>>, vector<1x2x32xf32>,
    return
  }
  func.func @transform_0(%arg0: i32) -> (i32, i32) {
    %c0_i32 = arith.constant 0 : i32
    %c0_i32_0 = arith.constant 0 : i32
    return %arg0, %c0_i32 : i32, i32
  }
  func.func @transform_1(%arg0: i32) -> (i32, i32) {
    %c0_i32 = arith.constant 0 : i32
    %c0_i32_0 = arith.constant 0 : i32
    return %arg0, %c0_i32 : i32, i32
  }
  func.func @transform_2(%arg0: i32) -> (i32, i32) {
    %c0_i32 = arith.constant 0 : i32
    %c0_i32_0 = arith.constant 0 : i32
    %c0_i32_1 = arith.constant 0 : i32
    return %c0_i32, %c0_i32_0 : i32, i32
  }
  func.func @transform_3(%arg0: i32) -> (i32, i32) {
    %c0_i32 = arith.constant 0 : i32
    %c0_i32_0 = arith.constant 0 : i32
    %c0_i32_1 = arith.constant 0 : i32
    return %c0_i32, %c0_i32_0 : i32, i32
  }
  func.func @transform_4(%arg0: i32) -> (i32, i32) {
    %c0_i32 = arith.constant 0 : i32
    %c0_i32_0 = arith.constant 0 : i32
    %c0_i32_1 = arith.constant 0 : i32
    return %c0_i32, %c0_i32_0 : i32, i32
  }
  func.func @transform_5(%arg0: i32) -> (i32, i32) {
    %c0_i32 = arith.constant 0 : i32
    %c0_i32_0 = arith.constant 0 : i32
    return %arg0, %c0_i32 : i32, i32
  }
  func.func @transform_6(%arg0: i32) -> (i32, i32) {
    %c0_i32 = arith.constant 0 : i32
    %c0_i32_0 = arith.constant 0 : i32
    return %arg0, %c0_i32 : i32, i32
  }
  func.func @transform_7(%arg0: i32) -> (i32, i32, i32) {
    %c0_i32 = arith.constant 0 : i32
    %c0_i32_0 = arith.constant 0 : i32
    %c0_i32_1 = arith.constant 0 : i32
    return %arg0, %c0_i32, %c0_i32_0 : i32, i32, i32
  }
}

</mosaic_0001>

<bundles_post_ra>
// kernel: tpu_custom_call.1
= control target key start
LH: loop header
LB: loop body
LE: loop exit
PB: predicated region body
PF: predicated region fallthrough
CT: control target
= control target key end

     0   :  { %s1621_s0 = inlined_call_operand.hbm [shape: f32[32,32], index: 0, kind: input, shape index: {}]   ;;  %s1622_s1 = inlined_call_operand.hbm [shape: f32[32,32], index: 1, kind: input, shape index: {}]   ;;  %s1623_s2 = inlined_call_operand.hbm [shape: f32[32,32], index: 2, kind: input, shape index: {}]   ;;  %s1624_s3 = inlined_call_operand.hbm [shape: f32[32,96], index: 3, kind: input, shape index: {}]   ;;  %s1625_s4 = inlined_call_operand.vmem [shape: f32[1,32], index: 4, kind: input, shape index: {}]   ;;  %s1626_s5 = inlined_call_operand.hbm [shape: f32[32,32], index: 5, kind: output, shape index: {0}]   ;;  %s1627_s6 = inlined_call_operand.hbm [shape: f32[32,32], index: 6, kind: output, shape index: {1}]   ;;  %s1628_s7 = inlined_call_operand.hbm [shape: f32[4,2,32], index: 7, kind: output, shape index: {2}]  }
   0x1   :  { %1635 = sst [smem:[#allocation22_spill]] %s1623_s2 }
   0x2   :  { %1636 = sst [smem:[#allocation23_spill]] %s1624_s3 }
   0x3   :  { %13 = vsyncpa [#allocation3], 0 }
   0x4   :  { %15 = vsyncpa [#allocation3 + $0x1], 0 }
   0x5   :  { %16 = vsyncpa [#allocation6], 0 }
   0x6   :  { %18 = vsyncpa [#allocation6 + $0x1], 0 }
   0x7   :  { %19 = vsyncpa [#allocation9], 0 }
   0x8   :  { %20 = vsyncpa [#allocation4], 0 }
   0x9   :  { %22 = vsyncpa [#allocation4 + $0x1], 0 }
   0xa   :  { %23 = vsyncpa [#allocation12], 0 }
   0xb   :  { %25 = vsyncpa [#allocation12 + $0x1], 0  ;;  %s1282_s24 = smov 0   ;;  %s1284_s25 = smov 0  }
   0xc   :  { %s1286_s26 = smov 0   ;;  %s1288_s27 = smov 0  }
   0xd LB: > { %1637 = sst [smem:[#allocation20_spill]] %s1221_s26  ;;  %s1303_s28 = sadd.s32 4294967295, %s1225_s27   ;;  %s1225_s27 = sphi %s1288_s27, %s1661_s27   ;;  %s1221_s26 = sphi %s1286_s26, %s1658_s26   ;;  %s1217_s25 = sphi %s1284_s25, %s1660_s25   ;;  %s1213_s24 = sphi %s1282_s24, %s1659_s24  }
   0xe   : > { %s1632_s29 = sadd.s32 4294967294, %s1225_s27   ;;  %p51_p0 = scmp.ne.s32.totalorder %s1217_s25, %s1213_s24 }
   0xf   : > { %p1629_p1 = scmp.eq.s32.totalorder %s1303_s28, 0  ;;  %p170_p3 = scmp.eq.s32.totalorder %s1632_s29, 3 }
  0x10   : > { %p808_p5 = scmp.ge.s32.totalorder %s1225_s27, 1  ;;  %p229_p7 = scmp.lt.s32.totalorder %s1225_s27, 5 }
  0x11   : > { %p1314_p4 = por %p1629_p1, %p51_p0  ;;  %p1319_p6 = por %p170_p3, %p51_p0 }
  0x12   : > { %p1324_p8 = pnand %p808_p5, %p229_p7  ;;  %s1227_s10 = smov [#allocation7]  }
  0x13   : > { %s1638_s30 = scalar_select %p1314_p4, 1, 0 }
  0x14   : > { %s1639_s8 = scalar_select %p1319_p6, 1, 0 }
  0x15   : > { %s1640_s9 = scalar_select %p1324_p8, 1, 0 }
  0x16   : > { %s241_s11 = sshll.u32 %s1227_s10, 4  ;;  %p897_p9 = pneg %p1324_p8  ;;  %s242_s11 = int_to_ptr.vmem [resolvable:$true] %s241_s11 }
  0x17   : > { %s1228_s13 = smov [#allocation8]   ;;  %s1642_s2 = sld [smem:[#allocation22_spill]] }
  0x18   : > { %p1332_p10 = pnand %p897_p9, %p1629_p1  ;;  %s254_s14 = sshll.u32 %s1228_s13, 4  ;;  %s1336_s14 = int_to_ptr.vmem [resolvable:$true] %s254_s14 }
  0x1a   : > { %p973_p12 = pneg %p1332_p10 }
  0x1d   : > { %s971_s17 = scalar_lea.hbm %s1642_s2, 512 }
  0x1e   : > { %p972_p11 = scmp.ne.s32.totalorder %s1642_s2, %s971_s17  ;;  %p978_p3 = scmp.lt.u32.totalorder %s971_s17, %s1642_s2 }
  0x20   : > { %p974_p13 = pnand %p973_p12, %p972_p11 }
  0x22   : > { %p975_p0 = pneg %p974_p13 }
  0x24   : > { %p980_p5 = pnand %p978_p3, %p975_p0 }
  0x26   : > { %983 = shalt.err (!%p980_p5)
}
  0x27   : > { %s984_s22 = scalar_lea.vmem %s242_s11, 512  ;;  %p992_p2 = scmp.lt.s32.totalorder %s242_s11, %s242_s11 }
  0x28   : > { %p985_p7 = scmp.ne.s32.totalorder %s242_s11, %s984_s22  ;;  %p993_p6 = scmp.lt.s32.totalorder %s984_s22, %s984_s22 }
  0x2a   : > { %p987_p9 = pnand %p985_p7, %p973_p12  ;;  %p994_p4 = por %p993_p6, %p992_p2 }
  0x2c   : > { %p988_p1 = pneg %p987_p9 }
  0x2e   : > { %p995_p8 = pnand %p994_p4, %p988_p1 }
  0x30   : > { %998 = shalt.err (!%p995_p8)
}
  0x31   : > { %s1229_s23 = smov 128   ;;  %s1230_s10 = smov 8  }
  0x32   : > { %900 = dma.hbm_to_vmem [thread:$0]  (!%p1332_p10), %s1642_s2, 512, %s242_s11, [#allocation6], %s1229_s23, %s1229_s23, %s1230_s10  }
  0x33   : > { %s1643_s3 = sld [smem:[#allocation23_spill]] }
  0x39   : > { %s999_s18 = scalar_lea.hbm %s1643_s3, 512 }
  0x3a   : > { %p1000_p11 = scmp.ne.s32.totalorder %s1643_s3, %s999_s18  ;;  %p1006_p4 = scmp.lt.u32.totalorder %s999_s18, %s1643_s3 }
  0x3c   : > { %p1002_p1 = pnand %p1000_p11, %p973_p12 }
  0x3e   : > { %p1003_p2 = pneg %p1002_p1 }
  0x40   : > { %p1008_p6 = pnand %p1006_p4, %p1003_p2 }
  0x42   : > { %1011 = shalt.err (!%p1008_p6)
}
  0x43   : > { %s1012_s11 = scalar_lea.vmem %s1336_s14, 512  ;;  %p1020_p3 = scmp.lt.s32.totalorder %s1336_s14, %s1336_s14 }
  0x44   : > { %p1013_p8 = scmp.ne.s32.totalorder %s1336_s14, %s1012_s11  ;;  %p1021_p5 = scmp.lt.s32.totalorder %s1012_s11, %s1012_s11 }
  0x46   : > { %p1015_p13 = pnand %p1013_p8, %p973_p12  ;;  %p1022_p7 = por %p1021_p5, %p1020_p3 }
  0x48   : > { %p1016_p0 = pneg %p1015_p13 }
  0x4a   : > { %p1023_p9 = pnand %p1022_p7, %p1016_p0 }
  0x4c   : > { %1026 = shalt.err (!%p1023_p9)
}
  0x4d   : > { %903 = dma.hbm_to_vmem [thread:$0]  (!%p1332_p10), %s1643_s3, 512, %s1336_s14, [#allocation9], %s1229_s23, %s1229_s23, %s1230_s10  }
  0x4e   : > { %s1386_s16 = sadd.s32 1, %s1225_s27   ;;  %s38_s12 = sadd.s32 1, %s1221_s26 }
  0x4f   : > { %s35_s17 = ssub.s32 %s1225_s27, %s1386_s16  ;;  %p45_p12 = scmp.ne.s32.totalorder %s1221_s26, %s1217_s25 }
  0x50   : > { %p36_p11 = scmp.eq.s32.totalorder %s35_s17, 0  ;;  %p46_p1 = scmp.eq.s32.totalorder %s1225_s27, 0 }
  0x51   : > { %p1644_p2 = scmp.eq.s32.totalorder %s1303_s28, 3  ;;  %p923_p6 = scmp.lt.s32.totalorder %s1225_s27, 4 }
  0x52   : > { %s1402_s19 = scalar_select %p36_p11, %s1221_s26, %s38_s12  }
  0x53   : > { %p1396_p4 = por %p1644_p2, %p45_p12  ;;  %p47_p8 = por %p46_p1, %p45_p12 }
  0x54   : > { %1646 = sst [smem:[#allocation21_spill]] %s1402_s19  ;;  %s271_s20 = sand.u32 1, %s1221_s26  }
  0x55   : > { %s1645_s18 = scalar_select %p1396_p4, 1, 0 }
  0x56   : > { %s1405_s14 = sshll.u32 %s271_s20, 3  ;;  %s813_s23 = sshll.u32 %s1225_s27, 7 }
  0x57   : > { %s1411_s22 = scalar_lea.hbm %s1621_s0, %s813_s23  ;;  %s275_s11 = scalar_lea.vmem [#allocation2], %s1405_s14 }
  0x58   : > { %s282_s13 = sshll.u32 %s275_s11, 4  ;;  %p1416_p10 = pnand %p923_p6, %p47_p8  ;;  %s1414_s13 = int_to_ptr.vmem [resolvable:$true] %s282_s13 }
  0x59   : > { %s1423_s10 = scalar_lea.hbm %s1622_s1, %s813_s23  ;;  %s289_s21 = sand.u32 1, %s1225_s27  }
  0x5a   : > { %s272_s29 = scalar_lea.sflag [#allocation3], %s271_s20  ;;  %s1027_s2 = scalar_lea.hbm %s1411_s22, 128 }
  0x5b   : > { %p1028_p13 = scmp.ne.s32.totalorder %s1411_s22, %s1027_s2  ;;  %p1029_p0 = pneg %p1416_p10 }
  0x5c   : > { %s1032_s19 = scalar_lea.hbm %s1621_s0, 512  ;;  %p1033_p7 = scmp.lt.u32.totalorder %s1411_s22, %s1621_s0 }
  0x5d   : > { %p1030_p3 = pnand %p1029_p0, %p1028_p13  ;;  %p1034_p9 = scmp.lt.u32.totalorder %s1032_s19, %s1027_s2 }
  0x5e   : > { %p1036_p11 = scmp.lt.u32.totalorder %s1027_s2, %s1411_s22 }
  0x5f   : > { %p1031_p5 = pneg %p1030_p3  ;;  %p1035_p12 = por %p1034_p9, %p1033_p7 }
  0x61   : > { %p1037_p1 = por %p1036_p11, %p1035_p12 }
  0x63   : > { %p1038_p2 = pnand %p1037_p1, %p1031_p5 }
  0x65   : > { %1041 = shalt.err (!%p1038_p2)
}
  0x66   : > { %s1042_s20 = scalar_lea.vmem %s1414_s13, 128  ;;  %s1231_s3 = smov [#allocation2]  }
  0x67   : > { %p1043_p6 = scmp.ne.s32.totalorder %s1414_s13, %s1042_s20  ;;  %s1047_s23 = sshll.u32 %s1231_s3, 4  ;;  %s1048_s23 = int_to_ptr.vmem [resolvable:$false] %s1047_s23 }
  0x68   : > { %s1049_s26 = scalar_lea.vmem %s1048_s23, 256  ;;  %p1050_p3 = scmp.lt.s32.totalorder %s1414_s13, %s1048_s23 }
  0x69   : > { %p1045_p8 = pnand %p1043_p6, %p1029_p0  ;;  %p1051_p7 = scmp.lt.s32.totalorder %s1049_s26, %s1042_s20 }
  0x6b   : > { %p1046_p13 = pneg %p1045_p8  ;;  %p1052_p9 = por %p1051_p7, %p1050_p3 }
  0x6d   : > { %p1053_p12 = pnand %p1052_p9, %p1046_p13 }
  0x6f   : > { %1056 = shalt.err (!%p1053_p12)
}
  0x70   : > { %907 = dma.hbm_to_vmem [thread:$0]  (!%p1416_p10), %s1411_s22, 128, %s1414_s13, %s272_s29  }
  0x71   : > { %s293_s2 = scalar_lea.vmem [#allocation5], %s1405_s14  ;;  %s290_s17 = scalar_lea.sflag [#allocation6], %s289_s21 }
  0x72   : > { %s300_s19 = sshll.u32 %s293_s2, 4  ;;  %s1057_s11 = scalar_lea.hbm %s1423_s10, 128  ;;  %s301_s19 = int_to_ptr.vmem [resolvable:$true] %s300_s19 }
  0x73   : > { %p1058_p5 = scmp.ne.s32.totalorder %s1423_s10, %s1057_s11  ;;  %s1062_s3 = scalar_lea.hbm %s1622_s1, 512 }
  0x74   : > { %p1063_p2 = scmp.lt.u32.totalorder %s1423_s10, %s1622_s1  ;;  %p1064_p6 = scmp.lt.u32.totalorder %s1062_s3, %s1057_s11 }
  0x75   : > { %p1060_p11 = pnand %p1058_p5, %p1029_p0  ;;  %p1066_p13 = scmp.lt.u32.totalorder %s1057_s11, %s1423_s10 }
  0x76   : > { %p1065_p8 = por %p1064_p6, %p1063_p2 }
  0x77   : > { %p1061_p1 = pneg %p1060_p11 }
  0x78   : > { %p1067_p3 = por %p1066_p13, %p1065_p8 }
  0x7a   : > { %p1068_p7 = pnand %p1067_p3, %p1061_p1 }
  0x7c   : > { %1071 = shalt.err (!%p1068_p7)
}
  0x7d   : > { %s1072_s29 = scalar_lea.vmem %s301_s19, 128  ;;  %s1232_s14 = smov [#allocation5]  }
  0x7e   : > { %p1073_p9 = scmp.ne.s32.totalorder %s301_s19, %s1072_s29  ;;  %s1077_s22 = sshll.u32 %s1232_s14, 4  ;;  %s1078_s22 = int_to_ptr.vmem [resolvable:$false] %s1077_s22 }
  0x7f   : > { %s1079_s13 = scalar_lea.vmem %s1078_s22, 256  ;;  %p1080_p11 = scmp.lt.s32.totalorder %s301_s19, %s1078_s22 }
  0x80   : > { %p1075_p12 = pnand %p1073_p9, %p1029_p0  ;;  %p1081_p4 = scmp.lt.s32.totalorder %s1079_s13, %s1072_s29 }
  0x82   : > { %p1076_p5 = pneg %p1075_p12  ;;  %p1082_p2 = por %p1081_p4, %p1080_p11 }
  0x84   : > { %p1083_p6 = pnand %p1082_p2, %p1076_p5 }
  0x86   : > { %1086 = shalt.err (!%p1083_p6)
}
  0x87   : > { %910 = dma.hbm_to_vmem [thread:$0]  (!%p1416_p10), %s1423_s10, 128, %s301_s19, %s290_s17  }
  0x88   : > { %p1648_p1 = scmp.ne.s32.totalorder %s1640_s9, 0 }
  0x89   : > { %s1476_s21 = sand.u32 (!%p1648_p1), 1, %s1217_s25   ;;  %p1649_p4 = scmp.ne.s32.totalorder (!%p1648_p1), %s1638_s30, 0 }
  0x8a   : > { %309 = sbr.rel (%p1648_p1) target bundleno = 538 (0x21a), region = 40  ;;  %s1479_s2 = sshll.u32 (!%p1648_p1), %s1476_s21, 3 }
  0x8b   : > { %s312_s11 = scalar_lea.sflag (!%p1648_p1), [#allocation3], %s1476_s21  ;;  %s315_s12 = scalar_lea.vmem (!%p1648_p1), [#allocation2], %s1479_s2 }
  0x91   : > { %1188 = dma.done.wait (%p1649_p4), %s312_s11, 128  }
  0x92   : > { %1190 = vsyncadd (%p1649_p4), %s312_s11, 4294967168  ;;  %s320_s9 = sand.u32 1, %s1303_s28   ;;  %s324_s10 = scalar_lea.vmem [#allocation5], %s1479_s2 }
  0x93   : > { %s321_s15 = scalar_lea.sflag [#allocation6], %s320_s9 }
  0x94   : > { %1192 = dma.done.wait (%p1649_p4), %s321_s15, 128  }
  0x95   : > { %1194 = vsyncadd (%p1649_p4), %s321_s15, 4294967168  ;;  %p1650_p10 = scmp.eq.s32.totalorder %s1303_s28, 0 }
  0x97   : > { %1196 = dma.done.wait (%p1650_p10), [#allocation6], 512   ;;  %p1651_p0 = pmov %p1650_p10 }
  0x99   : > { %1198 = vsyncadd (%p1651_p0), [#allocation6], 4294966784  ;;  %p1652_p8 = pmov %p1651_p0 }
  0x9a   : > { %p1653_p13 = pmov %p1651_p0 }
  0x9b   : > { %1200 = dma.done.wait (%p1652_p8), [#allocation9], 512  }
  0x9c   : > { %1202 = vsyncadd (%p1653_p13), [#allocation9], 4294966784  ;;  %v1233_v0 = vmov 0.0|0.0   ;;  %vm1234_vm0 = vmmov 0   ;;  %v1235_v1 = vmov 0.0   ;;  %v379_v2 = vld [vmem:[#allocation8] sm:$0xff] }
  0x9d   : > { %867 = vmatprep.subr.bf16.mxu0 %v1233_v0  ;;  %853 = vmatprep.mubr.msk.f32.mxu0 %vm1234_vm0, %v1235_v1  ;;  %v380_v3 = vld [vmem:[#allocation8 + $0x8] sm:$0xff]  ;;  %v381_v4 = vld [vmem:[#allocation8 + $0x10] sm:$0xff]  ;;  %v382_v6 = vld [vmem:[#allocation8 + $0x18] sm:$0xff]  ;;  %vm383_vm1 = vcmask 261120   ;;  %s363_s30 = scalar_lea.vmem [#allocation10], %s1479_s2  ;;  %s1236_s19 = smov 64  }
  0x9e   : > { %873 = vmatprep.subr.bf16.mxu1 %v1233_v0  ;;  %864 = vmatprep.mubr.msk.f32.mxu1 %vm1234_vm0, %v1235_v1  ;;  %v868_v5 = vpack.c.bf16 %v380_v3, %v379_v2  ;;  %v464_v7 = vld [vmem:[#allocation7] sm:$0xff]  ;;  %v465_v8 = vld [vmem:[#allocation7 + $0x8] sm:$0xff]  ;;  %v466_v9 = vld [vmem:[#allocation7 + $0x10] sm:$0xff]  ;;  %v871_v11 = vpack.c.bf16 %v382_v6, %v381_v4  ;;  %s1237_s17 = smov 96   ;;  %s830_s20 = sshll.u32 %s1303_s28, 7 }
  0x9f   : > { %v467_v10 = vld [vmem:[#allocation7 + $0x18] sm:$0xff]  ;;  %v874_v12 = vpack.c.bf16 %v465_v8, %v464_v7  ;;  %v463_v15 = vld [vmem:[%s315_s12] sm:$0xff]  ;;  %s1517_s26 = scalar_lea.hbm %s1626_s5, %s830_s20  ;;  %s608_s29 = sshll.u32 %s363_s30, 4  ;;  %s609_s29 = int_to_ptr.vmem [resolvable:$true] %s608_s29 }
  0xa0   : > { %869 = vmatpush3.bf16.msra.mxu0 %v868_v5  ;;  %v877_v13 = vpack.c.bf16 %v467_v10, %v466_v9  ;;  %v378_v14 = vld [vmem:[%s324_s10] sm:$0xff]  ;;  %s585_s14 = scalar_lea.sflag [#allocation4], %s1476_s21  ;;  %s1087_s22 = scalar_lea.vmem %s609_s29, 128 }
  0xa1   : > { %870 = vmatprep.subr.bf16.mxu0 %v1233_v0  ;;  %875 = vmatpush3.bf16.msra.mxu1 %v874_v12  ;;  %p1088_p3 = scmp.ne.s32.totalorder %s609_s29, %s1087_s22  ;;  %p1654_p7 = scmp.ne.s32.totalorder %s1645_s18, 0 }
  0xa2   : > { %876 = vmatprep.subr.bf16.mxu1 %v1233_v0  ;;  %s1238_s13 = smov [#allocation10]  }
  0xa3   : > { %p1089_p9 = pnand %p1088_p3, %p1654_p7  ;;  %s1091_s11 = sshll.u32 %s1238_s13, 4  ;;  %s1092_s11 = int_to_ptr.vmem [resolvable:$false] %s1091_s11 }
  0xa4   : > { %872 = vmatpush3.bf16.msra.mxu0 %v871_v11  ;;  %s1093_s12 = scalar_lea.vmem %s1092_s11, 256  ;;  %p1094_p5 = scmp.lt.s32.totalorder %s609_s29, %s1092_s11 }
  0xa5   : > { %878 = vmatpush3.bf16.msra.mxu1 %v877_v13  ;;  %p1090_p12 = pneg %p1089_p9  ;;  %p1095_p11 = scmp.lt.s32.totalorder %s1093_s12, %s1087_s22 }
  0xa7   : > { %854 = vmatmul.mubr.msk.f32.vlgmr.msra.gmra.mrb[0].mxu0 %vm383_vm1, %v378_v14  ;;  %p1096_p2 = por %p1095_p11, %p1094_p5 }
  0xa8   : > { %865 = vmatmul.mubr.msk.f32.vlgmr.msra.gmra.mrb[0].mxu1 %vm383_vm1, %v463_v15 }
  0xa9   : > { %p1097_p6 = pnand %p1096_p2, %p1090_p12 }
 0x17a   : > { %v453_v16 = vpop.f32.mrb[0].mxu0 }
 0x17b   : > { %457 = vst.msk [vmem:[%s363_s30] sm:$0xff] %vm383_vm1, %v453_v16  ;;  %468 = vrot.lane.b32.xlu0 %v453_v16, %s1236_s19  ;;  %v855_v17 = vpop.f32.mrb[1].mxu0  ;;  %v540_v18 = vpop.f32.mrb[0].mxu1 }
 0x17c   : > { %v866_v19 = vpop.f32.mrb[1].mxu1 }
 0x17f   : > { %459 = vrot.lane.b32.xlu0 %v453_v16, %s1237_s17 }
 0x180   : > { %1100 = shalt.err (!%p1097_p6)
}
 0x181   : > { %s1101_s15 = scalar_lea.hbm %s1517_s26, 128  ;;  %s1105_s19 = scalar_lea.hbm %s1626_s5, 512 }
 0x182   : > { %p1102_p1 = scmp.ne.s32.totalorder %s1517_s26, %s1101_s15  ;;  %p1106_p0 = scmp.lt.u32.totalorder %s1517_s26, %s1626_s5 }
 0x183   : > { %p1107_p8 = scmp.lt.u32.totalorder %s1105_s19, %s1101_s15  ;;  %p1109_p3 = scmp.lt.u32.totalorder %s1101_s15, %s1517_s26 }
 0x184   : > { %p1103_p4 = pnand %p1102_p1, %p1654_p7 }
 0x185   : > { %p1108_p13 = por %p1107_p8, %p1106_p0 }
 0x186   : > { %p1104_p10 = pneg %p1103_p4 }
 0x187   : > { %p1110_p9 = por %p1109_p3, %p1108_p13 }
 0x189   : > { %p1111_p12 = pnand %p1110_p9, %p1104_p10 }
 0x18b   : > { %1114 = shalt.err (!%p1111_p12)
}
 0x18c   : > { %891 = dma.vmem_to_hbm [thread:$0]  (%p1654_p7), %s609_s29, 128, %s1517_s26, %s585_s14   ;;  %v826_v20 = vld [vmem:[%s1625_s4] ss:$0 sm:$0xff]  ;;  %v1239_v24 = vmov 1983009808   ;;  %v558_v26 = vlaneseq }
 0x18d   : > { %s370_s13 = scalar_lea.vmem [#allocation11], %s1479_s2  ;;  %s1546_s10 = scalar_lea.hbm %s1627_s6, %s830_s20  ;;  %v556_v25 = vunpack.c.l.s4 %v1239_v24 }
 0x18e   : > { %s621_s11 = sshll.u32 %s370_s13, 4  ;;  %s1553_s2 = scalar_lea.sflag [#allocation12], %s320_s9  ;;  %s1548_s11 = int_to_ptr.vmem [resolvable:$true] %s621_s11 }
 0x18f   : > { %s1115_s26 = scalar_lea.vmem %s1548_s11, 128  ;;  %s1240_s20 = smov [#allocation11]  }
 0x190   : > { %p1116_p5 = scmp.ne.s32.totalorder %s1548_s11, %s1115_s26  ;;  %s1119_s29 = sshll.u32 %s1240_s20, 4  ;;  %s1120_s29 = int_to_ptr.vmem [resolvable:$false] %s1119_s29 }
 0x191   : > { %s1121_s14 = scalar_lea.vmem %s1120_s29, 256  ;;  %p1122_p6 = scmp.lt.s32.totalorder %s1548_s11, %s1120_s29 }
 0x192   : > { %p1117_p11 = pnand %p1116_p5, %p1654_p7  ;;  %p1123_p1 = scmp.lt.s32.totalorder %s1121_s14, %s1115_s26 }
 0x194   : > { %p1118_p2 = pneg %p1117_p11  ;;  %p1124_p4 = por %p1123_p1, %p1122_p6 }
 0x196   : > { %p1125_p10 = pnand %p1124_p4, %p1118_p2 }
 0x1ed   : > { %v469_v21 = vpop.permute.xlu0 %468 }
 0x1ee   : > { %v541_v22 = vadd.f32 %v540_v18, %v469_v21 }
 0x1f0   : > { %v551_v23 = vadd.f32 %v826_v20, %v541_v22 }
 0x1f1   : > { %v460_v27 = vpop.permute.xlu0 %459 }
 0x1f2   : > { %969 = vtanh.f32 %v551_v23  ;;  %462 = vst.msk [vmem:[%s370_s13] sm:$0xff] %vm383_vm1, %v460_v27 }
 0x1f3   : > { %1128 = shalt.err (!%p1125_p10)
}
 0x1f4   : > { %s1129_s9 = scalar_lea.hbm %s1546_s10, 128  ;;  %s1133_s17 = scalar_lea.hbm %s1627_s6, 512 }
 0x1f5   : > { %p1130_p0 = scmp.ne.s32.totalorder %s1546_s10, %s1129_s9  ;;  %p1134_p3 = scmp.lt.u32.totalorder %s1546_s10, %s1627_s6 }
 0x1f6   : > { %p1135_p9 = scmp.lt.u32.totalorder %s1133_s17, %s1129_s9  ;;  %p1137_p5 = scmp.lt.u32.totalorder %s1129_s9, %s1546_s10 }
 0x1f7   : > { %p1131_p8 = pnand %p1130_p0, %p1654_p7 }
 0x1f8   : > { %p1136_p12 = por %p1135_p9, %p1134_p3 }
 0x1f9   : > { %p1132_p13 = pneg %p1131_p8 }
 0x1fa   : > { %p1138_p11 = por %p1137_p5, %p1136_p12 }
 0x1fc   : > { %p1139_p2 = pnand %p1138_p11, %p1132_p13 }
 0x1fe   : > { %1142 = shalt.err (!%p1139_p2)
}
 0x1ff   : > { %892 = dma.vmem_to_hbm [thread:$0]  (%p1654_p7), %s1548_s11, 128, %s1546_s10, %s1553_s2   ;;  %v557_v28 = vunpack.c.0.s8 %v556_v25  ;;  %v559_v29 = vshrl.u32 %v558_v26, 7  ;;  %v970_v31 = vpop.eup %969  ;;  %vm575_vm2 = vcmask 254976  }
 0x200   : > { %v554_v32 = vcombine.high %v970_v31, %v970_v31  ;;  %s823_s22 = sshll.u32 %s1476_s21, 1  ;;  %s832_s13 = sshll.u32 %s1303_s28, 5 }
 0x201   : > { %v560_v30 = vsub.s32 %v557_v28, %v559_v29  ;;  %s377_s12 = scalar_lea.vmem [#allocation13], %s823_s22  ;;  %s1582_s26 = scalar_lea.hbm %s1628_s7, %s832_s13 }
 0x202   : > { %s634_s11 = sshll.u32 %s377_s12, 4  ;;  %s1241_s20 = smov [#allocation13]   ;;  %s635_s11 = int_to_ptr.vmem [resolvable:$true] %s634_s11 }
 0x203   : > { %v561_v33 = vrot.slane %v970_v31, %v560_v30  ;;  %v568_v34 = vrot.slane %v554_v32, %v560_v30  ;;  %s1143_s21 = scalar_lea.vmem %s635_s11, 32  ;;  %s1147_s29 = sshll.u32 %s1241_s20, 4  ;;  %s1148_s29 = int_to_ptr.vmem [resolvable:$false] %s1147_s29 }
 0x204   : > { %p1144_p6 = scmp.ne.s32.totalorder %s635_s11, %s1143_s21  ;;  %s1149_s28 = scalar_lea.vmem %s1148_s29, 64 }
 0x205   : > { %v569_v35 = vcombine.high %v561_v33, %v561_v33  ;;  %v570_v36 = vcombine.high %v568_v34, %v568_v34  ;;  %v576_v38 = vsel %vm575_vm2, %v561_v33, -inf  ;;  %v578_v39 = vsel %vm575_vm2, %v568_v34, -inf  ;;  %p1150_p10 = scmp.lt.s32.totalorder %s635_s11, %s1148_s29  ;;  %p1151_p0 = scmp.lt.s32.totalorder %s1149_s28, %s1143_s21 }
 0x206   : > { %p1145_p1 = pnand %p1144_p6, %p1654_p7 }
 0x207   : > { %v577_v37 = vsel %vm575_vm2, %v569_v35, -inf  ;;  %v579_v40 = vsel %vm575_vm2, %v570_v36, -inf  ;;  %p1152_p8 = por %p1151_p0, %p1150_p10 }
 0x208   : > { %v580_v41 = vmax.f32 %v576_v38, %v577_v37  ;;  %v581_v42 = vmax.f32 %v578_v39, %v579_v40  ;;  %p1146_p4 = pneg %p1145_p1 }
 0x20a   : > { %v582_v43 = vmax.f32 %v580_v41, %v581_v42  ;;  %p1153_p13 = pnand %p1152_p8, %p1146_p4 }
 0x20c   : > { %583 = vst.msk [vmem:[%s377_s12] sm:$0x3] %vm575_vm2, %v582_v43 }
 0x20d   : > { %1156 = shalt.err (!%p1153_p13)
}
 0x20e   : > { %s1157_s14 = scalar_lea.hbm %s1582_s26, 32  ;;  %s1161_s19 = scalar_lea.hbm %s1628_s7, 128 }
 0x20f   : > { %p1158_p3 = scmp.ne.s32.totalorder %s1582_s26, %s1157_s14  ;;  %p1162_p5 = scmp.lt.u32.totalorder %s1582_s26, %s1628_s7 }
 0x210   : > { %p1163_p11 = scmp.lt.u32.totalorder %s1161_s19, %s1157_s14  ;;  %p1165_p6 = scmp.lt.u32.totalorder %s1157_s14, %s1582_s26 }
 0x211   : > { %p1159_p9 = pnand %p1158_p3, %p1654_p7 }
 0x212   : > { %p1164_p2 = por %p1163_p11, %p1162_p5 }
 0x213   : > { %p1160_p12 = pneg %p1159_p9 }
 0x214   : > { %p1166_p1 = por %p1165_p6, %p1164_p2 }
 0x216   : > { %p1167_p4 = pnand %p1166_p1, %p1160_p12 }
 0x218   : > { %1170 = shalt.err (!%p1167_p4)
}
 0x219   : > { %893 = dma.vmem_to_hbm [thread:$0]  (%p1654_p7), %s635_s11, 32, %s1582_s26, %s1553_s2  }
 0x21a PF: > { %p926_p10 = scmp.ge.s32.totalorder %s1225_s27, 2  ;;  %s646_s23 = sand.u32 1, %s1213_s24  }
 0x21b   : > { %p1655_p0 = scmp.ne.s32.totalorder %s1639_s8, 0  ;;  %s647_s22 = scalar_lea.sflag [#allocation4], %s646_s23 }
 0x21d   : > { %p912_p8 = pnand %p926_p10, %p1655_p0 }
 0x21f   : > { %1204 = dma.done.wait (!%p912_p8), %s647_s22, 128  }
 0x220   : > { %1206 = vsyncadd (!%p912_p8), %s647_s22, 4294967168  ;;  %s1656_s13 = sadd.s32 4294967294, %s1225_s27  }
 0x221   : > { %s655_s12 = sand.u32 1, %s1656_s13  }
 0x222   : > { %s656_s15 = scalar_lea.sflag [#allocation12], %s655_s12 }
 0x223   : > { %1208 = dma.done.wait (!%p912_p8), %s656_s15, 160  }
 0x224   : > { %1210 = vsyncadd (!%p912_p8), %s656_s15, 4294967136  ;;  %s1657_s18 = sld [smem:[#allocation20_spill]]  ;;  %s1658_s26 = sld [smem:[#allocation21_spill]] }
 0x225   : > { %p28_p7 = scmp.ge.s32.totalorder %s1386_s16, 6   ;;  %s1659_s24 = smov %s1217_s25 }
 0x226   : > { %s1661_s27 = smov %s1386_s16 }
 0x227   :  { %30 = sbr.rel (!%p28_p7) target bundleno = 13 (0xd), region = 138 }
 0x22a   : > { %s1660_s25 = smov %s1657_s18 }
 0x22e   :  { %670 = vsyncpa [#allocation3], 1 }
 0x22f   :  { %672 = vsyncpa [#allocation3 + $0x1], 1 }
 0x230   :  { %673 = vsyncpa [#allocation6], 1 }
 0x231   :  { %675 = vsyncpa [#allocation6 + $0x1], 1 }
 0x232   :  { %676 = vsyncpa [#allocation9], 1 }
 0x233   :  { %677 = vsyncpa [#allocation4], 1 }
 0x234   :  { %679 = vsyncpa [#allocation4 + $0x1], 1 }
 0x235   :  { %680 = vsyncpa [#allocation12], 1 }
 0x236   :  { %682 = vsyncpa [#allocation12 + $0x1], 1 }

</bundles_post_ra>
